<compile_context>
chip_gen: v7x
topology: tpu7x:2x2x1
jax: 0.10.0
libtpu: 0.0.40
codegen_flags: <defaults>
</compile_context>

<pallas_src>
import jax
import jax.numpy as jnp
from jax import lax
from jax.experimental import pallas as pl
from jax.experimental.pallas import tpu as pltpu


def _round_up(n, m):
    return ((n + m - 1) // m) * m


# Transposed-RHS matmul dims: contract lhs dim 1 with rhs dim 1 -> (M, rows(rhs))
_NT_DIM_NUMBERS = (((1,), (1,)), ((), ()))


def _discriminator_kernel(x_ref, w1_ref, b1_ref, w2_ref, b2_ref, w3_ref,
                          b3_ref, out_ref):
    # x_ref : (TB, D)  f32   (cast to bf16 in-kernel; VPU has idle slots here)
    # w1    : (D, Hp)  bf16  (resident)      b1/b2: (1, Hp) f32 (resident)
    # w2    : (Hp, Hp) bf16  (resident)      w3   : (1, Hp) f32 (resident row)
    # b3    : (1,)     f32 in SMEM           out  : (1, TB) f32 (lane-dense)
    x = x_ref[...].astype(jnp.bfloat16)

    # fc1 + relu (f32 accumulate / epilogue)
    h1 = jnp.dot(x, w1_ref[...], preferred_element_type=jnp.float32)
    h1 = jnp.maximum(h1 + b1_ref[...], 0.0)                      # (TB, Hp)
    # TODO(synk): F.dropout(training=True) is stochastic; modeled as identity
    # (eval / inference semantics).

    # fc2 + relu
    h2 = jnp.dot(h1.astype(jnp.bfloat16), w2_ref[...],
                 preferred_element_type=jnp.float32)
    h2 = jnp.maximum(h2 + b2_ref[...], 0.0)                      # (TB, Hp)

    # fc3 + sigmoid: (1, Hp) x (TB, Hp)^T -> (1, TB) so the store is lane-dense.
    logits = lax.dot_general(w3_ref[...], h2,
                             dimension_numbers=_NT_DIM_NUMBERS,
                             preferred_element_type=jnp.float32)  # (1, TB)
    z = logits + b3_ref[0]
    out_ref[...] = 1.0 / (1.0 + jnp.exp(-z))


def prepare_params(params):
    """One-time weight layout: pad hidden dim 100 -> 128, cast matmul weights to
    bf16. Padded rows/cols are exact zeros, so results are unchanged.
    Hoisted out of the per-call path so a training/eval loop pays this once."""
    w1, b1, w2, b2, w3, b3 = params          # w: (in, out) f32, b: (out,) f32
    hid = w1.shape[1]
    hp = _round_up(hid, 128)
    pad_h = hp - hid
    w1p = jnp.pad(w1.astype(jnp.float32), ((0, 0), (0, pad_h))).astype(jnp.bfloat16)
    w2p = jnp.pad(w2.astype(jnp.float32), ((0, pad_h), (0, pad_h))).astype(jnp.bfloat16)
    w3r = jnp.pad(w3.astype(jnp.float32).T, ((0, 0), (0, pad_h)))     # (1, Hp) f32
    b1p = jnp.pad(b1.reshape(1, -1).astype(jnp.float32), ((0, 0), (0, pad_h)))
    b2p = jnp.pad(b2.reshape(1, -1).astype(jnp.float32), ((0, 0), (0, pad_h)))
    b3s = b3.reshape(-1).astype(jnp.float32)                          # (1,) -> SMEM
    return (w1p, b1p, w2p, b2p, w3r, b3s)


def _build_call(D, Hp, TB, Bp, steps, vmem_limit, single_buffer_weights):
    resident_kw = ({"pipeline_mode": pl.Buffered(1)}
                   if single_buffer_weights else {})
    const = lambda i: (0, 0)
    return pl.pallas_call(
        _discriminator_kernel,
        out_shape=jax.ShapeDtypeStruct((1, Bp), jnp.float32),
        grid=(steps,),
        in_specs=[
            pl.BlockSpec((TB, D), lambda i: (i, 0)),                  # x (f32)
            pl.BlockSpec((D, Hp), const, **resident_kw),              # w1
            pl.BlockSpec((1, Hp), const, **resident_kw),              # b1
            pl.BlockSpec((Hp, Hp), const, **resident_kw),             # w2
            pl.BlockSpec((1, Hp), const, **resident_kw),              # b2
            pl.BlockSpec((1, Hp), const, **resident_kw),              # w3 row
            pl.BlockSpec(memory_space=pltpu.MemorySpace.SMEM),        # b3 scalar
        ],
        out_specs=pl.BlockSpec((1, TB), lambda i: (0, i)),
        compiler_params=pltpu.CompilerParams(
            dimension_semantics=("parallel",),
            vmem_limit_bytes=vmem_limit),
    )


def discriminator_forward(x, prepared_params):
    """x: (B, C, H, W) float32 (NCHW). Returns (B, 1) float32 probabilities."""
    w1p, b1p, w2p, b2p, w3r, b3s = prepared_params
    B = x.shape[0]
    x2d = x.reshape(B, -1).astype(jnp.float32)   # row-major flatten == torch .view
    D = x2d.shape[1]
    Hp = w1p.shape[1]
    assert w1p.shape[0] == D, (w1p.shape, D)

    # ---- hardware-aware tile selection -------------------------------------
    try:
        vmem_cap = int(pltpu.get_tpu_info().vmem_capacity_bytes)
    except Exception:
        vmem_cap = 64 << 20                      # conservative (v7x per-core VMEM)
    budget = int(vmem_cap * 0.85)                # headroom for Mosaic scratch

    # Single-buffered resident weights/biases (bf16 matmuls, f32 biases/w3 row).
    resident = (D * Hp + Hp * Hp) * 2 + 3 * Hp * 4
    margin = 8 << 20                             # intermediates + compiler scratch
    per_row = 2 * D * 4 + 2 * 4                  # double-buffered f32 x row + out lane

    if B <= 128:
        TB = B                                   # single full block, zero padding
    else:
        tb_fit = max(128, ((budget - resident - margin) // per_row) // 128 * 128)
        tb_cap = 1024 if vmem_cap >= (96 << 20) else 512
        TB = min(tb_cap, tb_fit)
        if pl.cdiv(B, TB) < 2:
            # >=2 grid steps so ("parallel",) can use both TensorCores on v7x.
            TB = max(128, (pl.cdiv(B, 2) + 127) // 128 * 128)
        # TODO(synk): for very large D the resident w1 + x tile can exceed v7x's
        # 64 MiB VMEM; a K-reduction grid axis over D for fc1 would be needed.
    steps = pl.cdiv(B, TB)
    Bp = steps * TB

    est = (2 * TB * D * 4          # double-buffered f32 x tile
           + resident              # resident weights/biases
           + 2 * TB * 4            # double-buffered (1, TB) f32 output block
           + 4 * TB * Hp * 4)      # h1/h2 f32 intermediates (rough)
    vmem_limit = int(min(max(est + (4 << 20), 32 << 20), budget))

    args = (x2d, w1p, b1p, w2p, b2p, w3r, b3s)
    try:
        out = _build_call(D, Hp, TB, Bp, steps, vmem_limit, True)(*args)
    except Exception:
        # Fallback if pl.Buffered(1) is rejected by this jax/Mosaic version.
        out = _build_call(D, Hp, TB, Bp, steps, vmem_limit, False)(*args)

    return out.reshape(-1)[:B].reshape(B, 1)


def init_params(key, in_features, hidden=100, out=1):
    """Deterministic init mimicking nn.Linear (uniform +-1/sqrt(fan_in))."""
    ks = jax.random.split(key, 6)

    def linear(kw, kb, fan_in, fan_out):
        bound = 1.0 / jnp.sqrt(jnp.float32(fan_in))
        w = jax.random.uniform(kw, (fan_in, fan_out), jnp.float32, -bound, bound)
        b = jax.random.uniform(kb, (fan_out,), jnp.float32, -bound, bound)
        return w, b

    w1, b1 = linear(ks[0], ks[1], in_features, hidden)
    w2, b2 = linear(ks[2], ks[3], hidden, hidden)
    w3, b3 = linear(ks[4], ks[5], hidden, out)
    return (w1, b1, w2, b2, w3, b3)


def _reference_forward(x, params):
    """Pure-JAX f32 reference for a sanity check."""
    w1, b1, w2, b2, w3, b3 = params
    h = x.reshape(x.shape[0], -1).astype(jnp.float32)
    h = jnp.maximum(h @ w1 + b1, 0.0)
    h = jnp.maximum(h @ w2 + b2, 0.0)
    return jax.nn.sigmoid(h @ w3 + b3)


if __name__ == "__main__":
    key = jax.random.PRNGKey(0)
    k_x, k_p = jax.random.split(key)

    # Small shapes: batch=2, channels=4, spatial=16 -> in_features = 4*16*16 = 1024
    B, C, H, W = 2, 4, 16, 16
    x = jax.random.normal(k_x, (B, C, H, W), jnp.float32)

    params = init_params(k_p, in_features=C * H * W)
    prepared = prepare_params(params)            # one-time weight layout

    out = discriminator_forward(x, prepared)
    out = jax.block_until_ready(out)

    ref = _reference_forward(x, params)
    assert out.shape == (B, 1), out.shape
    # bf16 weights/activations in fc1/fc2 matmuls -> loosened tolerance vs f32 ref.
    assert jnp.allclose(out, ref, atol=2e-2, rtol=2e-2), (out, ref)

    print("KERNEL_OK")
</pallas_src>

<mosaic_0001>
module attributes {stable_mosaic.version = 11 : i64} {
  func.func @_discriminator_kernel(%arg0: i32, %arg1: memref<2x1024xf32, #tpu.memory_space<vmem>>, %arg2: memref<1024x128xbf16, #tpu.memory_space<vmem>>, %arg3: memref<1x128xf32, #tpu.memory_space<vmem>>, %arg4: memref<128x128xbf16, #tpu.memory_space<vmem>>, %arg5: memref<1x128xf32, #tpu.memory_space<vmem>>, %arg6: memref<1x128xf32, #tpu.memory_space<vmem>>, %arg7: memref<1xf32, #tpu.memory_space<smem>>, %arg8: memref<1x2xf32, #tpu.memory_space<vmem>>) attributes {dimension_semantics = [#tpu.dimension_semantics<parallel>], iteration_bounds = array<i64: 1>, scalar_prefetch = 0 : i64, scratch_operands = 0 : i64, tpu.core_type = #tpu.core_type<tc>, window_params = [{transform_indices = @transform_0, window_bounds = array<i64: 2, 1024>}, {pipeline_mode = #tpu.pipeline_mode<synchronous>, transform_indices = @transform_1, window_bounds = array<i64: 1024, 128>}, {pipeline_mode = #tpu.pipeline_mode<synchronous>, transform_indices = @transform_2, window_bounds = array<i64: 1, 128>}, {pipeline_mode = #tpu.pipeline_mode<synchronous>, transform_indices = @transform_3, window_bounds = array<i64: 128, 128>}, {pipeline_mode = #tpu.pipeline_mode<synchronous>, transform_indices = @transform_4, window_bounds = array<i64: 1, 128>}, {pipeline_mode = #tpu.pipeline_mode<synchronous>, transform_indices = @transform_5, window_bounds = array<i64: 1, 128>}, {transform_indices = @transform_6, window_bounds = array<i64: 1>}, {transform_indices = @transform_7, window_bounds = array<i64: 1, 2>}]} {
    %c0 = arith.constant 0 : index
    %c0_0 = arith.constant 0 : index
    %0 = vector.load %arg1[%c0, %c0_0] : memref<2x1024xf32, #tpu.memory_space<vmem>>, vector<2x1024xf32>
    %1 = arith.truncf %0 : vector<2x1024xf32> to vector<2x1024xbf16>
    %c0_1 = arith.constant 0 : index
    %c0_2 = arith.constant 0 : index
    %2 = vector.load %arg2[%c0_1, %c0_2] : memref<1024x128xbf16, #tpu.memory_space<vmem>>, vector<1024x128xbf16>
    %cst = arith.constant dense<0.000000e+00> : vector<2x128xf32>
    %3 = tpu.matmul %1, %2, %cst {dimension_numbers = #tpu.dot_dimension_numbers<[1], [0], [0], [1], [0, 0, 1, 1], [], []>} : vector<2x1024xbf16>, vector<1024x128xbf16>, vector<2x128xf32> -> vector<2x128xf32>
    %c0_3 = arith.constant 0 : index
    %c0_4 = arith.constant 0 : index
    %4 = vector.load %arg3[%c0_3, %c0_4] : memref<1x128xf32, #tpu.memory_space<vmem>>, vector<1x128xf32>
    %5 = vector.broadcast %4 : vector<1x128xf32> to vector<2x128xf32>
    %6 = arith.addf %3, %5 : vector<2x128xf32>
    %cst_5 = arith.constant 0.000000e+00 : f32
    %7 = vector.broadcast %cst_5 : f32 to vector<2x128xf32>
    %8 = arith.maximumf %6, %7 : vector<2x128xf32>
    %9 = arith.truncf %8 : vector<2x128xf32> to vector<2x128xbf16>
    %c0_6 = arith.constant 0 : index
    %c0_7 = arith.constant 0 : index
    %10 = vector.load %arg4[%c0_6, %c0_7] : memref<128x128xbf16, #tpu.memory_space<vmem>>, vector<128x128xbf16>
    %cst_8 = arith.constant dense<0.000000e+00> : vector<2x128xf32>
    %11 = tpu.matmul %9, %10, %cst_8 {dimension_numbers = #tpu.dot_dimension_numbers<[1], [0], [0], [1], [0, 0, 1, 1], [], []>} : vector<2x128xbf16>, vector<128x128xbf16>, vector<2x128xf32> -> vector<2x128xf32>
    %c0_9 = arith.constant 0 : index
    %c0_10 = arith.constant 0 : index
    %12 = vector.load %arg5[%c0_9, %c0_10] : memref<1x128xf32, #tpu.memory_space<vmem>>, vector<1x128xf32>
    %13 = vector.broadcast %12 : vector<1x128xf32> to vector<2x128xf32>
    %14 = arith.addf %11, %13 : vector<2x128xf32>
    %cst_11 = arith.constant 0.000000e+00 : f32
    %15 = vector.broadcast %cst_11 : f32 to vector<2x128xf32>
    %16 = arith.maximumf %14, %15 : vector<2x128xf32>
    %c0_12 = arith.constant 0 : index
    %c0_13 = arith.constant 0 : index
    %17 = vector.load %arg6[%c0_12, %c0_13] : memref<1x128xf32, #tpu.memory_space<vmem>>, vector<1x128xf32>
    %cst_14 = arith.constant dense<0.000000e+00> : vector<1x2xf32>
    %18 = tpu.matmul %17, %16, %cst_14 {dimension_numbers = #tpu.dot_dimension_numbers<[1], [1], [0], [0], [0, 0, 1, 0], [], []>} : vector<1x128xf32>, vector<2x128xf32>, vector<1x2xf32> -> vector<1x2xf32>
    %c0_15 = arith.constant 0 : index
    %19 = memref.load %arg7[%c0_15] : memref<1xf32, #tpu.memory_space<smem>>
    %20 = vector.broadcast %19 : f32 to vector<1x2xf32>
    %21 = arith.addf %18, %20 : vector<1x2xf32>
    %cst_16 = arith.constant 0.000000e+00 : f32
    %22 = vector.broadcast %cst_16 : f32 to vector<1x2xf32>
    %23 = arith.subf %22, %21 : vector<1x2xf32>
    %24 = math.exp %23 : vector<1x2xf32>
    %cst_17 = arith.constant 1.000000e+00 : f32
    %25 = vector.broadcast %cst_17 : f32 to vector<1x2xf32>
    %26 = arith.addf %25, %24 : vector<1x2xf32>
    %cst_18 = arith.constant 1.000000e+00 : f32
    %27 = vector.broadcast %cst_18 : f32 to vector<1x2xf32>
    %28 = arith.divf %27, %26 : vector<1x2xf32>
    %c0_19 = arith.constant 0 : index
    %c0_20 = arith.constant 0 : index
    %29 = vector.load %arg8[%c0_19, %c0_20] : memref<1x2xf32, #tpu.memory_space<vmem>>, vector<1x2xf32>
    tpu.vector_store %arg8[%c0_19, %c0_20], %28 {strides = array<i32>} : memref<1x2xf32, #tpu.memory_space<vmem>>, vector<1x2xf32>,
    return
  }
  func.func @transform_0(%arg0: i32) -> (i32, i32) {
    %c0_i32 = arith.constant 0 : i32
    %c0_i32_0 = arith.constant 0 : i32
    return %arg0, %c0_i32 : i32, i32
  }
  func.func @transform_1(%arg0: i32) -> (i32, i32) {
    %c0_i32 = arith.constant 0 : i32
    %c0_i32_0 = arith.constant 0 : i32
    %c0_i32_1 = arith.constant 0 : i32
    return %c0_i32, %c0_i32_0 : i32, i32
  }
  func.func @transform_2(%arg0: i32) -> (i32, i32) {
    %c0_i32 = arith.constant 0 : i32
    %c0_i32_0 = arith.constant 0 : i32
    %c0_i32_1 = arith.constant 0 : i32
    return %c0_i32, %c0_i32_0 : i32, i32
  }
  func.func @transform_3(%arg0: i32) -> (i32, i32) {
    %c0_i32 = arith.constant 0 : i32
    %c0_i32_0 = arith.constant 0 : i32
    %c0_i32_1 = arith.constant 0 : i32
    return %c0_i32, %c0_i32_0 : i32, i32
  }
  func.func @transform_4(%arg0: i32) -> (i32, i32) {
    %c0_i32 = arith.constant 0 : i32
    %c0_i32_0 = arith.constant 0 : i32
    %c0_i32_1 = arith.constant 0 : i32
    return %c0_i32, %c0_i32_0 : i32, i32
  }
  func.func @transform_5(%arg0: i32) -> (i32, i32) {
    %c0_i32 = arith.constant 0 : i32
    %c0_i32_0 = arith.constant 0 : i32
    %c0_i32_1 = arith.constant 0 : i32
    return %c0_i32, %c0_i32_0 : i32, i32
  }
  func.func @transform_6(%arg0: i32) -> i32 {
    %c0_i32 = arith.constant 0 : i32
    %c0_i32_0 = arith.constant 0 : i32
    return %c0_i32 : i32
  }
  func.func @transform_7(%arg0: i32) -> (i32, i32) {
    %c0_i32 = arith.constant 0 : i32
    %c0_i32_0 = arith.constant 0 : i32
    return %c0_i32, %arg0 : i32, i32
  }
}

module attributes {stable_mosaic.version = 11 : i64} {
  func.func @_discriminator_kernel(%arg0: i32, %arg1: memref<2x1024xf32, #tpu.memory_space<vmem>>, %arg2: memref<1024x128xbf16, #tpu.memory_space<vmem>>, %arg3: memref<1x128xf32, #tpu.memory_space<vmem>>, %arg4: memref<128x128xbf16, #tpu.memory_space<vmem>>, %arg5: memref<1x128xf32, #tpu.memory_space<vmem>>, %arg6: memref<1x128xf32, #tpu.memory_space<vmem>>, %arg7: memref<1xf32, #tpu.memory_space<smem>>, %arg8: memref<1x2xf32, #tpu.memory_space<vmem>>) attributes {dimension_semantics = [#tpu.dimension_semantics<parallel>], iteration_bounds = array<i64: 1>, scalar_prefetch = 0 : i64, scratch_operands = 0 : i64, tpu.core_type = #tpu.core_type<tc>, window_params = [{transform_indices = @transform_0, window_bounds = array<i64: 2, 1024>}, {pipeline_mode = #tpu.pipeline_mode<synchronous>, transform_indices = @transform_1, window_bounds = array<i64: 1024, 128>}, {pipeline_mode = #tpu.pipeline_mode<synchronous>, transform_indices = @transform_2, window_bounds = array<i64: 1, 128>}, {pipeline_mode = #tpu.pipeline_mode<synchronous>, transform_indices = @transform_3, window_bounds = array<i64: 128, 128>}, {pipeline_mode = #tpu.pipeline_mode<synchronous>, transform_indices = @transform_4, window_bounds = array<i64: 1, 128>}, {pipeline_mode = #tpu.pipeline_mode<synchronous>, transform_indices = @transform_5, window_bounds = array<i64: 1, 128>}, {transform_indices = @transform_6, window_bounds = array<i64: 1>}, {transform_indices = @transform_7, window_bounds = array<i64: 1, 2>}]} {
    %c0 = arith.constant 0 : index
    %c0_0 = arith.constant 0 : index
    %0 = vector.load %arg1[%c0, %c0_0] : memref<2x1024xf32, #tpu.memory_space<vmem>>, vector<2x1024xf32>
    %1 = arith.truncf %0 : vector<2x1024xf32> to vector<2x1024xbf16>
    %c0_1 = arith.constant 0 : index
    %c0_2 = arith.constant 0 : index
    %2 = vector.load %arg2[%c0_1, %c0_2] : memref<1024x128xbf16, #tpu.memory_space<vmem>>, vector<1024x128xbf16>
    %cst = arith.constant dense<0.000000e+00> : vector<2x128xf32>
    %3 = tpu.matmul %1, %2, %cst {dimension_numbers = #tpu.dot_dimension_numbers<[1], [0], [0], [1], [0, 0, 1, 1], [], []>} : vector<2x1024xbf16>, vector<1024x128xbf16>, vector<2x128xf32> -> vector<2x128xf32>
    %c0_3 = arith.constant 0 : index
    %c0_4 = arith.constant 0 : index
    %4 = vector.load %arg3[%c0_3, %c0_4] : memref<1x128xf32, #tpu.memory_space<vmem>>, vector<1x128xf32>
    %5 = vector.broadcast %4 : vector<1x128xf32> to vector<2x128xf32>
    %6 = arith.addf %3, %5 : vector<2x128xf32>
    %cst_5 = arith.constant 0.000000e+00 : f32
    %7 = vector.broadcast %cst_5 : f32 to vector<2x128xf32>
    %8 = arith.maximumf %6, %7 : vector<2x128xf32>
    %9 = arith.truncf %8 : vector<2x128xf32> to vector<2x128xbf16>
    %c0_6 = arith.constant 0 : index
    %c0_7 = arith.constant 0 : index
    %10 = vector.load %arg4[%c0_6, %c0_7] : memref<128x128xbf16, #tpu.memory_space<vmem>>, vector<128x128xbf16>
    %cst_8 = arith.constant dense<0.000000e+00> : vector<2x128xf32>
    %11 = tpu.matmul %9, %10, %cst_8 {dimension_numbers = #tpu.dot_dimension_numbers<[1], [0], [0], [1], [0, 0, 1, 1], [], []>} : vector<2x128xbf16>, vector<128x128xbf16>, vector<2x128xf32> -> vector<2x128xf32>
    %c0_9 = arith.constant 0 : index
    %c0_10 = arith.constant 0 : index
    %12 = vector.load %arg5[%c0_9, %c0_10] : memref<1x128xf32, #tpu.memory_space<vmem>>, vector<1x128xf32>
    %13 = vector.broadcast %12 : vector<1x128xf32> to vector<2x128xf32>
    %14 = arith.addf %11, %13 : vector<2x128xf32>
    %cst_11 = arith.constant 0.000000e+00 : f32
    %15 = vector.broadcast %cst_11 : f32 to vector<2x128xf32>
    %16 = arith.maximumf %14, %15 : vector<2x128xf32>
    %c0_12 = arith.constant 0 : index
    %c0_13 = arith.constant 0 : index
    %17 = vector.load %arg6[%c0_12, %c0_13] : memref<1x128xf32, #tpu.memory_space<vmem>>, vector<1x128xf32>
    %cst_14 = arith.constant dense<0.000000e+00> : vector<1x2xf32>
    %18 = tpu.matmul %17, %16, %cst_14 {dimension_numbers = #tpu.dot_dimension_numbers<[1], [1], [0], [0], [0, 0, 1, 0], [], []>} : vector<1x128xf32>, vector<2x128xf32>, vector<1x2xf32> -> vector<1x2xf32>
    %c0_15 = arith.constant 0 : index
    %19 = memref.load %arg7[%c0_15] : memref<1xf32, #tpu.memory_space<smem>>
    %20 = vector.broadcast %19 : f32 to vector<1x2xf32>
    %21 = arith.addf %18, %20 : vector<1x2xf32>
    %cst_16 = arith.constant 0.000000e+00 : f32
    %22 = vector.broadcast %cst_16 : f32 to vector<1x2xf32>
    %23 = arith.subf %22, %21 : vector<1x2xf32>
    %24 = math.exp %23 : vector<1x2xf32>
    %cst_17 = arith.constant 1.000000e+00 : f32
    %25 = vector.broadcast %cst_17 : f32 to vector<1x2xf32>
    %26 = arith.addf %25, %24 : vector<1x2xf32>
    %cst_18 = arith.constant 1.000000e+00 : f32
    %27 = vector.broadcast %cst_18 : f32 to vector<1x2xf32>
    %28 = arith.divf %27, %26 : vector<1x2xf32>
    %c0_19 = arith.constant 0 : index
    %c0_20 = arith.constant 0 : index
    %29 = vector.load %arg8[%c0_19, %c0_20] : memref<1x2xf32, #tpu.memory_space<vmem>>, vector<1x2xf32>
    tpu.vector_store %arg8[%c0_19, %c0_20], %28 {strides = array<i32>} : memref<1x2xf32, #tpu.memory_space<vmem>>, vector<1x2xf32>,
    return
  }
  func.func @transform_0(%arg0: i32) -> (i32, i32) {
    %c0_i32 = arith.constant 0 : i32
    %c0_i32_0 = arith.constant 0 : i32
    return %arg0, %c0_i32 : i32, i32
  }
  func.func @transform_1(%arg0: i32) -> (i32, i32) {
    %c0_i32 = arith.constant 0 : i32
    %c0_i32_0 = arith.constant 0 : i32
    %c0_i32_1 = arith.constant 0 : i32
    return %c0_i32, %c0_i32_0 : i32, i32
  }
  func.func @transform_2(%arg0: i32) -> (i32, i32) {
    %c0_i32 = arith.constant 0 : i32
    %c0_i32_0 = arith.constant 0 : i32
    %c0_i32_1 = arith.constant 0 : i32
    return %c0_i32, %c0_i32_0 : i32, i32
  }
  func.func @transform_3(%arg0: i32) -> (i32, i32) {
    %c0_i32 = arith.constant 0 : i32
    %c0_i32_0 = arith.constant 0 : i32
    %c0_i32_1 = arith.constant 0 : i32
    return %c0_i32, %c0_i32_0 : i32, i32
  }
  func.func @transform_4(%arg0: i32) -> (i32, i32) {
    %c0_i32 = arith.constant 0 : i32
    %c0_i32_0 = arith.constant 0 : i32
    %c0_i32_1 = arith.constant 0 : i32
    return %c0_i32, %c0_i32_0 : i32, i32
  }
  func.func @transform_5(%arg0: i32) -> (i32, i32) {
    %c0_i32 = arith.constant 0 : i32
    %c0_i32_0 = arith.constant 0 : i32
    %c0_i32_1 = arith.constant 0 : i32
    return %c0_i32, %c0_i32_0 : i32, i32
  }
  func.func @transform_6(%arg0: i32) -> i32 {
    %c0_i32 = arith.constant 0 : i32
    %c0_i32_0 = arith.constant 0 : i32
    return %c0_i32 : i32
  }
  func.func @transform_7(%arg0: i32) -> (i32, i32) {
    %c0_i32 = arith.constant 0 : i32
    %c0_i32_0 = arith.constant 0 : i32
    return %c0_i32, %arg0 : i32, i32
  }
}

</mosaic_0001>

<bundles_post_ra>
// kernel: tpu_custom_call.1
= control target key start
LH: loop header
LB: loop body
LE: loop exit
PB: predicated region body
PF: predicated region fallthrough
CT: control target
= control target key end

     0   :  { %13 = vsyncpa [#allocation4], 0  ;;  %s1512_s0 = inlined_call_operand.hbm [shape: f32[2,1024], index: 0, kind: input, shape index: {}]   ;;  %s1513_s1 = inlined_call_operand.hbm [shape: bf16[1024,128], index: 1, kind: input, shape index: {}]   ;;  %s1514_s2 = inlined_call_operand.vmem [shape: f32[1,128], index: 2, kind: input, shape index: {}]   ;;  %s1515_s3 = inlined_call_operand.hbm [shape: bf16[128,128], index: 3, kind: input, shape index: {}]   ;;  %s1516_s4 = inlined_call_operand.vmem [shape: f32[1,128], index: 4, kind: input, shape index: {}]   ;;  %s1517_s5 = inlined_call_operand.vmem [shape: f32[1,128], index: 5, kind: input, shape index: {}]   ;;  %s1518_s6 = inlined_call_operand.<no memory space> [shape: f32[1], index: 6, kind: input, shape index: {}]   ;;  %s1519_s7 = inlined_call_operand.hbm [shape: f32[1,2], index: 7, kind: output, shape index: {}]  }
   0x1   :  { %14 = vsyncpa [#allocation7], 0 }
   0x2   :  { %15 = vsyncpa [#allocation5], 0  ;;  %s1391_s24 = smov [#allocation6]   ;;  %s1297_s28 = scalar_lea.hbm %s1513_s1, 8192 }
   0x3   :  { %s31_s25 = sshll.u32 %s1391_s24, 4  ;;  %p1298_p0 = scmp.ne.s32.totalorder %s1513_s1, %s1297_s28  ;;  %s32_s25 = int_to_ptr.vmem [resolvable:$true] %s31_s25 }
   0x4   :  { %p1301_p1 = scmp.lt.u32.totalorder %s1297_s28, %s1513_s1 }
   0x6   :  { %p1303_p2 = pnand %p1301_p1, %p1298_p0 }
   0x8   :  { %1306 = shalt.err (!%p1303_p2)
}
   0x9   :  { %s1307_s10 = scalar_lea.vmem %s32_s25, 8192  ;;  %p1312_p4 = scmp.lt.s32.totalorder %s32_s25, %s32_s25 }
   0xa   :  { %p1308_p3 = scmp.ne.s32.totalorder %s32_s25, %s1307_s10  ;;  %p1313_p5 = scmp.lt.s32.totalorder %s1307_s10, %s1307_s10 }
   0xc   :  { %p1314_p6 = por %p1313_p5, %p1312_p4 }
   0xe   :  { %p1315_p7 = pnand %p1314_p6, %p1308_p3 }
  0x10   :  { %1318 = shalt.err (!%p1315_p7)
}
  0x11   :  { %s1392_s11 = smov 64   ;;  %s1393_s12 = smov 4  }
  0x12   :  { %37 = dma.hbm_to_vmem [thread:$0]  %s1513_s1, 8192, %s32_s25, [#allocation7], %s1392_s11, %s1392_s11, %s1393_s12  }
  0x13   :  { %s1394_s15 = smov [#allocation3]   ;;  %s1395_s17 = smov [#allocation8]  }
  0x14   :  { %s22_s16 = sshll.u32 %s1394_s15, 4  ;;  %s45_s18 = sshll.u32 %s1395_s17, 4  ;;  %s23_s16 = int_to_ptr.vmem [resolvable:$true] %s22_s16  ;;  %s46_s18 = int_to_ptr.vmem [resolvable:$true] %s45_s18 }
  0x15   :  { %s1319_s21 = scalar_lea.hbm %s1512_s0, 256 }
  0x16   :  { %p1320_p8 = scmp.ne.s32.totalorder %s1512_s0, %s1319_s21  ;;  %p1323_p9 = scmp.lt.u32.totalorder %s1319_s21, %s1512_s0 }
  0x18   :  { %p1325_p10 = pnand %p1323_p9, %p1320_p8 }
  0x1a   :  { %1328 = shalt.err (!%p1325_p10)
}
  0x1b   :  { %s1329_s1 = scalar_lea.vmem %s23_s16, 256  ;;  %p1334_p12 = scmp.lt.s32.totalorder %s23_s16, %s23_s16 }
  0x1c   :  { %p1330_p11 = scmp.ne.s32.totalorder %s23_s16, %s1329_s1  ;;  %p1335_p13 = scmp.lt.s32.totalorder %s1329_s1, %s1329_s1 }
  0x1e   :  { %p1336_p0 = por %p1335_p13, %p1334_p12 }
  0x20   :  { %p1337_p1 = pnand %p1336_p0, %p1330_p11 }
  0x22   :  { %1340 = shalt.err (!%p1337_p1)
}
  0x23   :  { %25 = dma.hbm_to_vmem [thread:$0]  %s1512_s0, 256, %s23_s16, [#allocation4]  }
  0x24   :  { %s1341_s30 = scalar_lea.hbm %s1515_s3, 1024 }
  0x25   :  { %p1342_p2 = scmp.ne.s32.totalorder %s1515_s3, %s1341_s30  ;;  %p1345_p3 = scmp.lt.u32.totalorder %s1341_s30, %s1515_s3 }
  0x27   :  { %p1347_p4 = pnand %p1345_p3, %p1342_p2 }
  0x29   :  { %1350 = shalt.err (!%p1347_p4)
}
  0x2a   :  { %s1351_s14 = scalar_lea.vmem %s46_s18, 1024  ;;  %p1356_p6 = scmp.lt.s32.totalorder %s46_s18, %s46_s18 }
  0x2b   :  { %p1352_p5 = scmp.ne.s32.totalorder %s46_s18, %s1351_s14  ;;  %p1357_p7 = scmp.lt.s32.totalorder %s1351_s14, %s1351_s14 }
  0x2d   :  { %p1358_p8 = por %p1357_p7, %p1356_p6 }
  0x2f   :  { %p1359_p9 = pnand %p1358_p8, %p1352_p5 }
  0x31   :  { %1362 = shalt.err (!%p1359_p9)
}
  0x32   :  { %51 = dma.hbm_to_vmem [thread:$0]  %s1515_s3, 1024, %s46_s18, [#allocation7], %s1392_s11, %s1392_s11, %s1393_s12  }
  0x33   :  { %1385 = dma.done.wait [#allocation4], 256  }
  0x34   :  { %1386 = vsyncadd [#allocation4], 4294967040 }
  0x35   :  { %1387 = dma.done.wait [#allocation7], 9216  }
  0x36   :  { %1388 = vsyncadd [#allocation7], 4294958080  ;;  %v1219_v0 = vld [vmem:[#allocation6 + $0x40] sm:$0xff]   ;;  %v1223_v4 = vld [vmem:[#allocation6 + $0x48] sm:$0xff]   ;;  %v1396_v22 = vmov 1983009808   ;;  %v76_v24 = vlaneseq }
  0x37   :  { %v1220_v1 = vld [vmem:[#allocation6 + $0xc0] sm:$0xff]   ;;  %1086 = vmatprep.subr.bf16.mxu0 %v1219_v0  ;;  %v1224_v5 = vld [vmem:[#allocation6 + $0xc8] sm:$0xff]   ;;  %v1227_v8 = vld [vmem:[#allocation6 + $0x50] sm:$0xff]   ;;  %v74_v23 = vunpack.c.l.s4 %v1396_v22  ;;  %vm1398_vm0 = vmmov 0   ;;  %vm994_vm1 = vcmask 8192  }
  0x38   :  { %v1221_v2 = vld [vmem:[#allocation6] sm:$0xff]   ;;  %1108 = vmatprep.subr.bf16.mxu1 %v1220_v1  ;;  %v1225_v6 = vld [vmem:[#allocation6 + $0x8] sm:$0xff]   ;;  %v1228_v9 = vld [vmem:[#allocation6 + $0xd0] sm:$0xff]   ;;  %v77_v30 = vshrl.u32 %v76_v24, 7 }
  0x39   :  { %v1222_v3 = vld [vmem:[#allocation6 + $0x80] sm:$0xff]   ;;  %1087 = vmatpush3.bf16.msra.mxu0 %v1221_v2  ;;  %v1226_v7 = vld [vmem:[#allocation6 + $0x88] sm:$0xff]   ;;  %v1229_v10 = vld [vmem:[#allocation6 + $0x10] sm:$0xff]   ;;  %v75_v29 = vunpack.c.0.s8 %v74_v23 }
  0x3a   :  { %1109 = vmatpush3.bf16.msra.mxu1 %v1222_v3  ;;  %1088 = vmatprep.subr.bf16.mxu0 %v1223_v4  ;;  %v1230_v11 = vld [vmem:[#allocation6 + $0x90] sm:$0xff]   ;;  %v1231_v12 = vld [vmem:[#allocation6 + $0x58] sm:$0xff]   ;;  %v1235_v16 = vld [vmem:[#allocation6 + $0x60] sm:$0xff]  }
  0x3b   :  { %1110 = vmatprep.subr.bf16.mxu1 %v1224_v5  ;;  %v1232_v13 = vld [vmem:[#allocation6 + $0xd8] sm:$0xff]   ;;  %v1236_v17 = vld [vmem:[#allocation6 + $0xe0] sm:$0xff]   ;;  %v1239_v20 = vld [vmem:[#allocation6 + $0x68] sm:$0xff]   ;;  %v1482_v35 = vsub.s32 %v75_v29, %v77_v30 }
  0x3c   :  { %v1233_v14 = vld [vmem:[#allocation6 + $0x18] sm:$0xff]   ;;  %v1237_v18 = vld [vmem:[#allocation6 + $0x20] sm:$0xff]   ;;  %v1240_v21 = vld [vmem:[#allocation6 + $0xe8] sm:$0xff]  }
  0x3d   :  { %1089 = vmatpush3.bf16.msra.mxu0 %v1225_v6  ;;  %v1234_v15 = vld [vmem:[#allocation6 + $0x98] sm:$0xff]   ;;  %v1238_v19 = vld [vmem:[#allocation6 + $0xa0] sm:$0xff]   ;;  %v1241_v25 = vld [vmem:[#allocation6 + $0x28] sm:$0xff]  }
  0x3e   :  { %1111 = vmatpush3.bf16.msra.mxu1 %v1226_v7  ;;  %1090 = vmatprep.subr.bf16.mxu0 %v1227_v8  ;;  %v1242_v26 = vld [vmem:[#allocation6 + $0xa8] sm:$0xff]   ;;  %v1243_v27 = vld [vmem:[#allocation6 + $0x70] sm:$0xff]   ;;  %v1247_v33 = vld [vmem:[#allocation6 + $0x78] sm:$0xff]  }
  0x3f   :  { %1112 = vmatprep.subr.bf16.mxu1 %v1228_v9  ;;  %v1244_v28 = vld [vmem:[#allocation6 + $0xf0] sm:$0xff]   ;;  %v1248_v34 = vld [vmem:[#allocation6 + $0xf8] sm:$0xff]   ;;  %v1252_v41 = vld [vmem:[#allocation6 + $0x140] sm:$0xff]  }
  0x40   :  { %v1245_v31 = vld [vmem:[#allocation6 + $0x30] sm:$0xff]   ;;  %v1249_v36 = vld [vmem:[#allocation6 + $0x38] sm:$0xff]   ;;  %v1253_v42 = vld [vmem:[#allocation6 + $0x1c0] sm:$0xff]  }
  0x41   :  { %1091 = vmatpush3.bf16.msra.mxu0 %v1229_v10  ;;  %v1246_v32 = vld [vmem:[#allocation6 + $0xb0] sm:$0xff]   ;;  %v1250_v37 = vld [vmem:[#allocation6 + $0xb8] sm:$0xff]   ;;  %v1254_v46 = vld [vmem:[#allocation6 + $0x100] sm:$0xff]  }
  0x42   :  { %1113 = vmatpush3.bf16.msra.mxu1 %v1230_v11  ;;  %1092 = vmatprep.subr.bf16.mxu0 %v1231_v12  ;;  %v68_v38 = vld [vmem:[#allocation3] sm:$0xff]  ;;  %v1255_v49 = vld [vmem:[#allocation6 + $0x180] sm:$0xff]   ;;  %v1256_v51 = vld [vmem:[#allocation6 + $0x148] sm:$0xff]  }
  0x43   :  { %1114 = vmatprep.subr.bf16.mxu1 %v1232_v13  ;;  %v79_v39 = vrot.slane %v68_v38, %v1482_v35  ;;  %v72_v40 = vcombine.high %v68_v38, %v68_v38  ;;  %v1257_v53 = vld [vmem:[#allocation6 + $0x1c8] sm:$0xff]   ;;  %v1260_v56 = vld [vmem:[#allocation6 + $0x150] sm:$0xff]   ;;  %v1264_v60 = vld [vmem:[#allocation6 + $0x158] sm:$0xff]  }
  0x44   :  { %v1258_v54 = vld [vmem:[#allocation6 + $0x108] sm:$0xff]   ;;  %v1261_v57 = vld [vmem:[#allocation6 + $0x1d0] sm:$0xff]   ;;  %v1265_v61 = vld [vmem:[#allocation6 + $0x1d8] sm:$0xff]  }
  0x45   :  { %1093 = vmatpush3.bf16.msra.mxu0 %v1233_v14  ;;  %v87_v43 = vcombine.high %v79_v39, %v79_v39  ;;  %v86_v44 = vrot.slane %v72_v40, %v1482_v35  ;;  %v114_v45 = vpack.c.bf16 %v79_v39, %v79_v39  ;;  %v1259_v55 = vld [vmem:[#allocation6 + $0x188] sm:$0xff]   ;;  %v1262_v58 = vld [vmem:[#allocation6 + $0x110] sm:$0xff]   ;;  %v1266_v62 = vld [vmem:[#allocation6 + $0x118] sm:$0xff]  }
  0x46   :  { %1115 = vmatpush3.bf16.msra.mxu1 %v1234_v15  ;;  %1094 = vmatprep.subr.bf16.mxu0 %v1235_v16  ;;  %v1263_v59 = vld [vmem:[#allocation6 + $0x190] sm:$0xff]   ;;  %v1267_v63 = vld [vmem:[#allocation6 + $0x198] sm:$0xff]   ;;  %v1268_v0 = vld [vmem:[#allocation6 + $0x160] sm:$0xff]  }
  0x47   :  { %1116 = vmatprep.subr.bf16.mxu1 %v1236_v17  ;;  %v115_v47 = vpack.c.bf16 %v87_v43, %v87_v43  ;;  %v88_v48 = vcombine.high %v86_v44, %v86_v44  ;;  %v116_v50 = vpack.c.bf16 %v86_v44, %v86_v44  ;;  %v1269_v1 = vld [vmem:[#allocation6 + $0x1e0] sm:$0xff]   ;;  %v1272_v4 = vld [vmem:[#allocation6 + $0x168] sm:$0xff]   ;;  %v1276_v8 = vld [vmem:[#allocation6 + $0x170] sm:$0xff]  }
  0x48   :  { %v1270_v2 = vld [vmem:[#allocation6 + $0x120] sm:$0xff]   ;;  %v1273_v5 = vld [vmem:[#allocation6 + $0x1e8] sm:$0xff]   ;;  %v1277_v9 = vld [vmem:[#allocation6 + $0x1f0] sm:$0xff]  }
  0x49   :  { %1095 = vmatpush3.bf16.msra.mxu0 %v1237_v18  ;;  %673 = vmatprep.mubr.bf16.mxu0 %v115_v47  ;;  %v117_v52 = vpack.c.bf16 %v88_v48, %v88_v48  ;;  %v1271_v3 = vld [vmem:[#allocation6 + $0x1a0] sm:$0xff]   ;;  %v1274_v6 = vld [vmem:[#allocation6 + $0x128] sm:$0xff]   ;;  %v1278_v10 = vld [vmem:[#allocation6 + $0x130] sm:$0xff]  }
  0x4a   :  { %1117 = vmatpush3.bf16.msra.mxu1 %v1238_v19  ;;  %1096 = vmatprep.subr.bf16.mxu0 %v1239_v20  ;;  %v1275_v7 = vld [vmem:[#allocation6 + $0x1a8] sm:$0xff]   ;;  %v1279_v11 = vld [vmem:[#allocation6 + $0x1b0] sm:$0xff]   ;;  %v1280_v12 = vld [vmem:[#allocation6 + $0x178] sm:$0xff]  }
  0x4b   :  { %1118 = vmatprep.subr.bf16.mxu1 %v1240_v21  ;;  %713 = vmatprep.mubr.bf16.mxu1 %v117_v52  ;;  %v1281_v13 = vld [vmem:[#allocation6 + $0x1f8] sm:$0xff]   ;;  %v1287_v29 = vld [vmem:[#allocation8 + $0x10] sm:$0xff]  }
  0x4c   :  { %v1282_v14 = vld [vmem:[#allocation6 + $0x138] sm:$0xff]  }
  0x4d   :  { %1097 = vmatpush3.bf16.msra.mxu0 %v1241_v25  ;;  %v69_v15 = vld [vmem:[#allocation3 + $0x8] sm:$0xff] }
  0x4e   :  { %1119 = vmatpush3.bf16.msra.mxu1 %v1242_v26  ;;  %1098 = vmatprep.subr.bf16.mxu0 %v1243_v27  ;;  %v1283_v16 = vld [vmem:[#allocation6 + $0x1b8] sm:$0xff]   ;;  %v96_v17 = vrot.slane %v69_v15, %v1482_v35  ;;  %v89_v18 = vcombine.high %v69_v15, %v69_v15  ;;  %v1285_v26 = vld [vmem:[#allocation8] sm:$0xff]   ;;  %v1397_v27 = vmov 0.0  }
  0x4f   :  { %1120 = vmatprep.subr.bf16.mxu1 %v1244_v28  ;;  %v1286_v28 = vld [vmem:[#allocation8 + $0x8] sm:$0xff]   ;;  %v1288_v30 = vld [vmem:[#allocation8 + $0x18] sm:$0xff]  }
  0x50   :  { %v104_v19 = vcombine.high %v96_v17, %v96_v17  ;;  %v103_v20 = vrot.slane %v89_v18, %v1482_v35  ;;  %v118_v21 = vpack.c.bf16 %v96_v17, %v96_v17 }
  0x51   :  { %1099 = vmatpush3.bf16.msra.mxu0 %v1245_v31  ;;  %v1289_v31 = vld [vmem:[#allocation8 + $0x20] sm:$0xff]  }
  0x52   :  { %1121 = vmatpush3.bf16.msra.mxu1 %v1246_v32  ;;  %1100 = vmatprep.subr.bf16.mxu0 %v1247_v33  ;;  %v119_v22 = vpack.c.bf16 %v104_v19, %v104_v19  ;;  %v105_v23 = vcombine.high %v103_v20, %v103_v20  ;;  %v120_v24 = vpack.c.bf16 %v103_v20, %v103_v20  ;;  %v1290_v32 = vld [vmem:[#allocation8 + $0x28] sm:$0xff]   ;;  %v1291_v33 = vld [vmem:[#allocation8 + $0x30] sm:$0xff]  }
  0x53   :  { %1122 = vmatprep.subr.bf16.mxu1 %v1248_v34  ;;  %v1292_v34 = vld [vmem:[#allocation8 + $0x38] sm:$0xff]  }
  0x54   :  { %v121_v25 = vpack.c.bf16 %v105_v23, %v105_v23 }
  0x55   :  { %1101 = vmatpush3.bf16.msra.mxu0 %v1249_v36  ;;  %v1012_v36 = vld [vmem:[%s1514_s2] ss:$0 sm:$0xff] }
  0x56   :  { %1123 = vmatpush3.bf16.msra.mxu1 %v1250_v37  ;;  %1130 = vmatprep.subr.bf16.mxu0 %v1252_v41 }
  0x57   :  { %1152 = vmatprep.subr.bf16.mxu1 %v1253_v42 }
  0x58   :  { %674 = vmatmul.mubr.bf16.vlgmr.msra.gmra.mrb[0].mxu0 %v114_v45 }
  0x59   :  { %1131 = vmatpush3.bf16.msra.mxu0 %v1254_v46  ;;  %714 = vmatmul.mubr.bf16.vlgmr.msra.gmra.mrb[0].mxu1 %v116_v50 }
  0x5a   :  { %1132 = vmatprep.subr.bf16.mxu0 %v1256_v51  ;;  %1153 = vmatpush3.bf16.msra.mxu1 %v1255_v49 }
  0x5b   :  { %1154 = vmatprep.subr.bf16.mxu1 %v1257_v53  ;;  %753 = vmatprep.mubr.bf16.mxu0 %v119_v22 }
  0x5c   :  { %793 = vmatprep.mubr.bf16.mxu1 %v121_v25 }
  0x5d   :  { %1133 = vmatpush3.bf16.msra.mxu0 %v1258_v54 }
  0x5e   :  { %1134 = vmatprep.subr.bf16.mxu0 %v1260_v56  ;;  %1155 = vmatpush3.bf16.msra.mxu1 %v1259_v55 }
  0x5f   :  { %1156 = vmatprep.subr.bf16.mxu1 %v1261_v57 }
  0x61   :  { %1135 = vmatpush3.bf16.msra.mxu0 %v1262_v58 }
  0x62   :  { %1136 = vmatprep.subr.bf16.mxu0 %v1264_v60  ;;  %1157 = vmatpush3.bf16.msra.mxu1 %v1263_v59 }
  0x63   :  { %1158 = vmatprep.subr.bf16.mxu1 %v1265_v61 }
  0x65   :  { %1137 = vmatpush3.bf16.msra.mxu0 %v1266_v62  ;;  %v1077_v62 = vld [vmem:[%s1516_s4] ss:$0 sm:$0xff]  ;;  %s1399_s4 = smov [#allocation9]  }
  0x66   :  { %1138 = vmatprep.subr.bf16.mxu0 %v1268_v0  ;;  %1159 = vmatpush3.bf16.msra.mxu1 %v1267_v63  ;;  %s1002_s20 = sshll.u32 %s1399_s4, 4  ;;  %s1003_s20 = int_to_ptr.vmem [resolvable:$true] %s1002_s20 }
  0x67   :  { %1160 = vmatprep.subr.bf16.mxu1 %v1269_v1  ;;  %s1367_s21 = scalar_lea.vmem %s1003_s20, 32  ;;  %p1368_p11 = scmp.lt.s32.totalorder %s1003_s20, %s1003_s20 }
  0x69   :  { %1139 = vmatpush3.bf16.msra.mxu0 %v1270_v2 }
  0x6a   :  { %1140 = vmatprep.subr.bf16.mxu0 %v1272_v4  ;;  %1161 = vmatpush3.bf16.msra.mxu1 %v1271_v3 }
  0x6b   :  { %1162 = vmatprep.subr.bf16.mxu1 %v1273_v5  ;;  %v915_v5 = vld [vmem:[%s1517_s5] sm:$0x1]  ;;  %s1363_s5 = scalar_lea.vmem %s1003_s20, 16 }
  0x6c   :  { %p1364_p10 = scmp.ne.s32.totalorder %s1003_s20, %s1363_s5  ;;  %p1369_p12 = scmp.lt.s32.totalorder %s1367_s21, %s1363_s5 }
  0x6d   :  { %1141 = vmatpush3.bf16.msra.mxu0 %v1274_v6  ;;  %v917_v6 = vstv %s1518_s6 }
  0x6e   :  { %1142 = vmatprep.subr.bf16.mxu0 %v1276_v8  ;;  %1163 = vmatpush3.bf16.msra.mxu1 %v1275_v7  ;;  %p1370_p13 = por %p1369_p12, %p1368_p11 }
  0x6f   :  { %1164 = vmatprep.subr.bf16.mxu1 %v1277_v9 }
  0x70   :  { %p1371_p0 = pnand %p1370_p13, %p1364_p10 }
  0x71   :  { %1143 = vmatpush3.bf16.msra.mxu0 %v1278_v10 }
  0x72   :  { %1144 = vmatprep.subr.bf16.mxu0 %v1280_v12  ;;  %1165 = vmatpush3.bf16.msra.mxu1 %v1279_v11 }
  0x73   :  { %1166 = vmatprep.subr.bf16.mxu1 %v1281_v13 }
  0x75   :  { %1145 = vmatpush3.bf16.msra.mxu0 %v1282_v14 }
  0x76   :  { %1167 = vmatpush3.bf16.msra.mxu1 %v1283_v16  ;;  %1185 = vmatprep.subr.bf16.mxu0 %v1397_v27 }
  0x77   :  { %1205 = vmatprep.subr.mxu1 %v1397_v27 }
  0x78   :  { %754 = vmatmul.mubr.bf16.vlgmr.msra.gmra.mrb[4].mxu0 %v118_v21 }
  0x79   :  { %794 = vmatmul.mubr.bf16.vlgmr.msra.gmra.mrb[4].mxu1 %v120_v24  ;;  %1186 = vmatpush3.bf16.msra.mxu0 %v1285_v26 }
  0x7a   :  { %1187 = vmatprep.subr.bf16.mxu0 %v1397_v27  ;;  %1201 = vmatprep.mubr.msk.bf16.mxu0 %vm1398_vm0, %v1397_v27 }
  0x7b   :  { %1207 = vmatprep.mubr.msk.f32.mxu1 %vm1398_vm0, %v1397_v27 }
  0x7d   :  { %1188 = vmatpush3.bf16.msra.mxu0 %v1286_v28 }
  0x7e   :  { %1189 = vmatprep.subr.bf16.mxu0 %v1397_v27 }
  0x81   :  { %1190 = vmatpush3.bf16.msra.mxu0 %v1287_v29 }
  0x82   :  { %1191 = vmatprep.subr.bf16.mxu0 %v1397_v27 }
  0x85   :  { %1192 = vmatpush3.bf16.msra.mxu0 %v1288_v30 }
  0x86   :  { %1193 = vmatprep.subr.bf16.mxu0 %v1397_v27 }
  0x89   :  { %1194 = vmatpush3.bf16.msra.mxu0 %v1289_v31 }
  0x8a   :  { %1195 = vmatprep.subr.bf16.mxu0 %v1397_v27 }
  0x8d   :  { %1196 = vmatpush3.bf16.msra.mxu0 %v1290_v32 }
  0x8e   :  { %1197 = vmatprep.subr.bf16.mxu0 %v1397_v27 }
  0x91   :  { %1198 = vmatpush3.bf16.msra.mxu0 %v1291_v33 }
  0x92   :  { %1199 = vmatprep.subr.bf16.mxu0 %v1397_v27 }
  0x95   :  { %1200 = vmatpush3.bf16.msra.mxu0 %v1292_v34 }
 0x12b   :  { %v1102_v35 = vpop.f32.mrb[0].mxu0 }
 0x12c   :  { %v1103_v37 = vpop.f32.mrb[1].mxu0  ;;  %v1124_v38 = vpop.f32.mrb[0].mxu1 }
 0x12d   :  { %v1104_v39 = vadd.f32 %v1103_v37, %v1102_v35  ;;  %v1105_v40 = vpop.f32.mrb[2].mxu0  ;;  %v1125_v41 = vpop.f32.mrb[1].mxu1 }
 0x12e   :  { %v1106_v42 = vpop.f32.mrb[3].mxu0  ;;  %v1126_v44 = vadd.f32 %v1125_v41, %v1124_v38  ;;  %v1127_v45 = vpop.f32.mrb[2].mxu1 }
 0x12f   :  { %v676_v43 = vadd.f32 %v1104_v39, %v1012_v36  ;;  %v1128_v46 = vpop.f32.mrb[3].mxu1 }
 0x131   :  { %v716_v47 = vadd.f32 %v1126_v44, %v676_v43 }
 0x14b   :  { %v1146_v48 = vpop.f32.mrb[4].mxu0 }
 0x14c   :  { %v1147_v49 = vpop.f32.mrb[5].mxu0  ;;  %v1168_v50 = vpop.f32.mrb[4].mxu1 }
 0x14d   :  { %v1148_v51 = vadd.f32 %v1147_v49, %v1146_v48  ;;  %v1149_v52 = vpop.f32.mrb[6].mxu0  ;;  %v1169_v53 = vpop.f32.mrb[5].mxu1 }
 0x14e   :  { %v1150_v54 = vpop.f32.mrb[7].mxu0  ;;  %v1170_v56 = vadd.f32 %v1169_v53, %v1168_v50  ;;  %v1171_v57 = vpop.f32.mrb[6].mxu1 }
 0x14f   :  { %v756_v55 = vadd.f32 %v1148_v51, %v716_v47  ;;  %v1172_v58 = vpop.f32.mrb[7].mxu1 }
 0x151   :  { %v796_v59 = vadd.f32 %v1170_v56, %v756_v55 }
 0x153   :  { %v801_v60 = vmax.f32 %v796_v59, 0.0 }
 0x155   :  { %v802_v61 = vpack.c.bf16 %v801_v60, %v801_v60 }
 0x157   :  { %1202 = vmatmul.mubr.bf16.vlgmr.msra.gmra.mrb[8].mxu0 %v802_v61 }
 0x22a   :  { %v908_v63 = vpop.f32.mrb[8].mxu0 }
 0x22b   :  { %v909_v0 = vadd.f32 %v1077_v62, %v908_v63  ;;  %v1203_v1 = vpop.f32.mrb[9].mxu0 }
 0x22c   :  { %v911_v2 = vpop.f32.mrb[10].mxu0 }
 0x22d   :  { %v914_v3 = vmax.f32 %v909_v0, 0.0  ;;  %v1204_v4 = vpop.f32.mrb[11].mxu0 }
 0x22f   :  { %1206 = vmatpush3.xpose.msra.mxu1 %v914_v3 }
 0x232   :  { %1208 = vmatmul.mubr.f32.vlgmr.msra.gmra.mrb[8].mxu1 %v915_v5 }
 0x305   :  { %v984_v7 = vpop.f32.mrb[8].mxu1 }
 0x306   :  { %v985_v8 = vadd.f32 %v984_v7, %v917_v6  ;;  %v1209_v9 = vpop.f32.mrb[9].mxu1 }
 0x308   :  { %v988_v10 = vsub.f32 0.0, %v985_v8 }
 0x30a   :  { %v989_v11 = vmul.f32 1.442695, %v988_v10 }
 0x30c   :  { %1293 = vpow2.f32 %v989_v11 }
 0x316   :  { %v1294_v12 = vpop.eup %1293 }
 0x317   :  { %v991_v13 = vadd.f32 1.0, %v1294_v12 }
 0x319   :  { %1295 = vrcp.f32 %v991_v13 }
 0x323   :  { %v1296_v14 = vpop.eup %1295 }
 0x324   :  { %995 = vst.msk [vmem:[#allocation9] sm:$0x1] %vm994_vm1, %v1296_v14 }
 0x325   :  { %1374 = shalt.err (!%p1371_p0)
}
 0x326   :  { %s1375_s23 = scalar_lea.hbm %s1519_s7, 16 }
 0x327   :  { %p1376_p1 = scmp.ne.s32.totalorder %s1519_s7, %s1375_s23  ;;  %p1379_p2 = scmp.lt.u32.totalorder %s1375_s23, %s1519_s7 }
 0x329   :  { %p1381_p3 = pnand %p1379_p2, %p1376_p1 }
 0x32b   :  { %1384 = shalt.err (!%p1381_p3)
}
 0x32c   :  { %1005 = dma.vmem_to_hbm [thread:$0]  %s1003_s20, 16, %s1519_s7, [#allocation5]  }
 0x32d   :  { %1389 = dma.done.wait [#allocation5], 16  }
 0x32e   :  { %1390 = vsyncadd [#allocation5], 4294967280 }
 0x32f   :  { %1009 = vsyncpa [#allocation4], 1 }
 0x330   :  { %1010 = vsyncpa [#allocation7], 1 }
 0x331   :  { %1011 = vsyncpa [#allocation5], 1 }

// kernel: tpu_custom_call.1
= control target key start
LH: loop header
LB: loop body
LE: loop exit
PB: predicated region body
PF: predicated region fallthrough
CT: control target
= control target key end

     0   :  { %13 = vsyncpa [#allocation4], 0  ;;  %s1512_s0 = inlined_call_operand.hbm [shape: f32[2,1024], index: 0, kind: input, shape index: {}]   ;;  %s1513_s1 = inlined_call_operand.hbm [shape: bf16[1024,128], index: 1, kind: input, shape index: {}]   ;;  %s1514_s2 = inlined_call_operand.vmem [shape: f32[1,128], index: 2, kind: input, shape index: {}]   ;;  %s1515_s3 = inlined_call_operand.hbm [shape: bf16[128,128], index: 3, kind: input, shape index: {}]   ;;  %s1516_s4 = inlined_call_operand.vmem [shape: f32[1,128], index: 4, kind: input, shape index: {}]   ;;  %s1517_s5 = inlined_call_operand.vmem [shape: f32[1,128], index: 5, kind: input, shape index: {}]   ;;  %s1518_s6 = inlined_call_operand.<no memory space> [shape: f32[1], index: 6, kind: input, shape index: {}]   ;;  %s1519_s7 = inlined_call_operand.hbm [shape: f32[1,2], index: 7, kind: output, shape index: {}]  }
   0x1   :  { %14 = vsyncpa [#allocation7], 0 }
   0x2   :  { %15 = vsyncpa [#allocation5], 0  ;;  %s1391_s24 = smov [#allocation6]   ;;  %s1297_s28 = scalar_lea.hbm %s1513_s1, 8192 }
   0x3   :  { %s31_s25 = sshll.u32 %s1391_s24, 4  ;;  %p1298_p0 = scmp.ne.s32.totalorder %s1513_s1, %s1297_s28  ;;  %s32_s25 = int_to_ptr.vmem [resolvable:$true] %s31_s25 }
   0x4   :  { %p1301_p1 = scmp.lt.u32.totalorder %s1297_s28, %s1513_s1 }
   0x6   :  { %p1303_p2 = pnand %p1301_p1, %p1298_p0 }
   0x8   :  { %1306 = shalt.err (!%p1303_p2)
}
   0x9   :  { %s1307_s10 = scalar_lea.vmem %s32_s25, 8192  ;;  %p1312_p4 = scmp.lt.s32.totalorder %s32_s25, %s32_s25 }
   0xa   :  { %p1308_p3 = scmp.ne.s32.totalorder %s32_s25, %s1307_s10  ;;  %p1313_p5 = scmp.lt.s32.totalorder %s1307_s10, %s1307_s10 }
   0xc   :  { %p1314_p6 = por %p1313_p5, %p1312_p4 }
   0xe   :  { %p1315_p7 = pnand %p1314_p6, %p1308_p3 }
  0x10   :  { %1318 = shalt.err (!%p1315_p7)
}
  0x11   :  { %s1392_s11 = smov 64   ;;  %s1393_s12 = smov 4  }
  0x12   :  { %37 = dma.hbm_to_vmem [thread:$0]  %s1513_s1, 8192, %s32_s25, [#allocation7], %s1392_s11, %s1392_s11, %s1393_s12  }
  0x13   :  { %s1394_s15 = smov [#allocation3]   ;;  %s1395_s17 = smov [#allocation8]  }
  0x14   :  { %s22_s16 = sshll.u32 %s1394_s15, 4  ;;  %s45_s18 = sshll.u32 %s1395_s17, 4  ;;  %s23_s16 = int_to_ptr.vmem [resolvable:$true] %s22_s16  ;;  %s46_s18 = int_to_ptr.vmem [resolvable:$true] %s45_s18 }
  0x15   :  { %s1319_s21 = scalar_lea.hbm %s1512_s0, 256 }
  0x16   :  { %p1320_p8 = scmp.ne.s32.totalorder %s1512_s0, %s1319_s21  ;;  %p1323_p9 = scmp.lt.u32.totalorder %s1319_s21, %s1512_s0 }
  0x18   :  { %p1325_p10 = pnand %p1323_p9, %p1320_p8 }
  0x1a   :  { %1328 = shalt.err (!%p1325_p10)
}
  0x1b   :  { %s1329_s1 = scalar_lea.vmem %s23_s16, 256  ;;  %p1334_p12 = scmp.lt.s32.totalorder %s23_s16, %s23_s16 }
  0x1c   :  { %p1330_p11 = scmp.ne.s32.totalorder %s23_s16, %s1329_s1  ;;  %p1335_p13 = scmp.lt.s32.totalorder %s1329_s1, %s1329_s1 }
  0x1e   :  { %p1336_p0 = por %p1335_p13, %p1334_p12 }
  0x20   :  { %p1337_p1 = pnand %p1336_p0, %p1330_p11 }
  0x22   :  { %1340 = shalt.err (!%p1337_p1)
}
  0x23   :  { %25 = dma.hbm_to_vmem [thread:$0]  %s1512_s0, 256, %s23_s16, [#allocation4]  }
  0x24   :  { %s1341_s30 = scalar_lea.hbm %s1515_s3, 1024 }
  0x25   :  { %p1342_p2 = scmp.ne.s32.totalorder %s1515_s3, %s1341_s30  ;;  %p1345_p3 = scmp.lt.u32.totalorder %s1341_s30, %s1515_s3 }
  0x27   :  { %p1347_p4 = pnand %p1345_p3, %p1342_p2 }
  0x29   :  { %1350 = shalt.err (!%p1347_p4)
}
  0x2a   :  { %s1351_s14 = scalar_lea.vmem %s46_s18, 1024  ;;  %p1356_p6 = scmp.lt.s32.totalorder %s46_s18, %s46_s18 }
  0x2b   :  { %p1352_p5 = scmp.ne.s32.totalorder %s46_s18, %s1351_s14  ;;  %p1357_p7 = scmp.lt.s32.totalorder %s1351_s14, %s1351_s14 }
  0x2d   :  { %p1358_p8 = por %p1357_p7, %p1356_p6 }
  0x2f   :  { %p1359_p9 = pnand %p1358_p8, %p1352_p5 }
  0x31   :  { %1362 = shalt.err (!%p1359_p9)
}
  0x32   :  { %51 = dma.hbm_to_vmem [thread:$0]  %s1515_s3, 1024, %s46_s18, [#allocation7], %s1392_s11, %s1392_s11, %s1393_s12  }
  0x33   :  { %1385 = dma.done.wait [#allocation4], 256  }
  0x34   :  { %1386 = vsyncadd [#allocation4], 4294967040 }
  0x35   :  { %1387 = dma.done.wait [#allocation7], 9216  }
  0x36   :  { %1388 = vsyncadd [#allocation7], 4294958080  ;;  %v1219_v0 = vld [vmem:[#allocation6 + $0x40] sm:$0xff]   ;;  %v1223_v4 = vld [vmem:[#allocation6 + $0x48] sm:$0xff]   ;;  %v1396_v22 = vmov 1983009808   ;;  %v76_v24 = vlaneseq }
  0x37   :  { %v1220_v1 = vld [vmem:[#allocation6 + $0xc0] sm:$0xff]   ;;  %1086 = vmatprep.subr.bf16.mxu0 %v1219_v0  ;;  %v1224_v5 = vld [vmem:[#allocation6 + $0xc8] sm:$0xff]   ;;  %v1227_v8 = vld [vmem:[#allocation6 + $0x50] sm:$0xff]   ;;  %v74_v23 = vunpack.c.l.s4 %v1396_v22  ;;  %vm1398_vm0 = vmmov 0   ;;  %vm994_vm1 = vcmask 8192  }
  0x38   :  { %v1221_v2 = vld [vmem:[#allocation6] sm:$0xff]   ;;  %1108 = vmatprep.subr.bf16.mxu1 %v1220_v1  ;;  %v1225_v6 = vld [vmem:[#allocation6 + $0x8] sm:$0xff]   ;;  %v1228_v9 = vld [vmem:[#allocation6 + $0xd0] sm:$0xff]   ;;  %v77_v30 = vshrl.u32 %v76_v24, 7 }
  0x39   :  { %v1222_v3 = vld [vmem:[#allocation6 + $0x80] sm:$0xff]   ;;  %1087 = vmatpush3.bf16.msra.mxu0 %v1221_v2  ;;  %v1226_v7 = vld [vmem:[#allocation6 + $0x88] sm:$0xff]   ;;  %v1229_v10 = vld [vmem:[#allocation6 + $0x10] sm:$0xff]   ;;  %v75_v29 = vunpack.c.0.s8 %v74_v23 }
  0x3a   :  { %1109 = vmatpush3.bf16.msra.mxu1 %v1222_v3  ;;  %1088 = vmatprep.subr.bf16.mxu0 %v1223_v4  ;;  %v1230_v11 = vld [vmem:[#allocation6 + $0x90] sm:$0xff]   ;;  %v1231_v12 = vld [vmem:[#allocation6 + $0x58] sm:$0xff]   ;;  %v1235_v16 = vld [vmem:[#allocation6 + $0x60] sm:$0xff]  }
  0x3b   :  { %1110 = vmatprep.subr.bf16.mxu1 %v1224_v5  ;;  %v1232_v13 = vld [vmem:[#allocation6 + $0xd8] sm:$0xff]   ;;  %v1236_v17 = vld [vmem:[#allocation6 + $0xe0] sm:$0xff]   ;;  %v1239_v20 = vld [vmem:[#allocation6 + $0x68] sm:$0xff]   ;;  %v1482_v35 = vsub.s32 %v75_v29, %v77_v30 }
  0x3c   :  { %v1233_v14 = vld [vmem:[#allocation6 + $0x18] sm:$0xff]   ;;  %v1237_v18 = vld [vmem:[#allocation6 + $0x20] sm:$0xff]   ;;  %v1240_v21 = vld [vmem:[#allocation6 + $0xe8] sm:$0xff]  }
  0x3d   :  { %1089 = vmatpush3.bf16.msra.mxu0 %v1225_v6  ;;  %v1234_v15 = vld [vmem:[#allocation6 + $0x98] sm:$0xff]   ;;  %v1238_v19 = vld [vmem:[#allocation6 + $0xa0] sm:$0xff]   ;;  %v1241_v25 = vld [vmem:[#allocation6 + $0x28] sm:$0xff]  }
  0x3e   :  { %1111 = vmatpush3.bf16.msra.mxu1 %v1226_v7  ;;  %1090 = vmatprep.subr.bf16.mxu0 %v1227_v8  ;;  %v1242_v26 = vld [vmem:[#allocation6 + $0xa8] sm:$0xff]   ;;  %v1243_v27 = vld [vmem:[#allocation6 + $0x70] sm:$0xff]   ;;  %v1247_v33 = vld [vmem:[#allocation6 + $0x78] sm:$0xff]  }
  0x3f   :  { %1112 = vmatprep.subr.bf16.mxu1 %v1228_v9  ;;  %v1244_v28 = vld [vmem:[#allocation6 + $0xf0] sm:$0xff]   ;;  %v1248_v34 = vld [vmem:[#allocation6 + $0xf8] sm:$0xff]   ;;  %v1252_v41 = vld [vmem:[#allocation6 + $0x140] sm:$0xff]  }
  0x40   :  { %v1245_v31 = vld [vmem:[#allocation6 + $0x30] sm:$0xff]   ;;  %v1249_v36 = vld [vmem:[#allocation6 + $0x38] sm:$0xff]   ;;  %v1253_v42 = vld [vmem:[#allocation6 + $0x1c0] sm:$0xff]  }
  0x41   :  { %1091 = vmatpush3.bf16.msra.mxu0 %v1229_v10  ;;  %v1246_v32 = vld [vmem:[#allocation6 + $0xb0] sm:$0xff]   ;;  %v1250_v37 = vld [vmem:[#allocation6 + $0xb8] sm:$0xff]   ;;  %v1254_v46 = vld [vmem:[#allocation6 + $0x100] sm:$0xff]  }
  0x42   :  { %1113 = vmatpush3.bf16.msra.mxu1 %v1230_v11  ;;  %1092 = vmatprep.subr.bf16.mxu0 %v1231_v12  ;;  %v68_v38 = vld [vmem:[#allocation3] sm:$0xff]  ;;  %v1255_v49 = vld [vmem:[#allocation6 + $0x180] sm:$0xff]   ;;  %v1256_v51 = vld [vmem:[#allocation6 + $0x148] sm:$0xff]  }
  0x43   :  { %1114 = vmatprep.subr.bf16.mxu1 %v1232_v13  ;;  %v79_v39 = vrot.slane %v68_v38, %v1482_v35  ;;  %v72_v40 = vcombine.high %v68_v38, %v68_v38  ;;  %v1257_v53 = vld [vmem:[#allocation6 + $0x1c8] sm:$0xff]   ;;  %v1260_v56 = vld [vmem:[#allocation6 + $0x150] sm:$0xff]   ;;  %v1264_v60 = vld [vmem:[#allocation6 + $0x158] sm:$0xff]  }
  0x44   :  { %v1258_v54 = vld [vmem:[#allocation6 + $0x108] sm:$0xff]   ;;  %v1261_v57 = vld [vmem:[#allocation6 + $0x1d0] sm:$0xff]   ;;  %v1265_v61 = vld [vmem:[#allocation6 + $0x1d8] sm:$0xff]  }
  0x45   :  { %1093 = vmatpush3.bf16.msra.mxu0 %v1233_v14  ;;  %v87_v43 = vcombine.high %v79_v39, %v79_v39  ;;  %v86_v44 = vrot.slane %v72_v40, %v1482_v35  ;;  %v114_v45 = vpack.c.bf16 %v79_v39, %v79_v39  ;;  %v1259_v55 = vld [vmem:[#allocation6 + $0x188] sm:$0xff]   ;;  %v1262_v58 = vld [vmem:[#allocation6 + $0x110] sm:$0xff]   ;;  %v1266_v62 = vld [vmem:[#allocation6 + $0x118] sm:$0xff]  }
  0x46   :  { %1115 = vmatpush3.bf16.msra.mxu1 %v1234_v15  ;;  %1094 = vmatprep.subr.bf16.mxu0 %v1235_v16  ;;  %v1263_v59 = vld [vmem:[#allocation6 + $0x190] sm:$0xff]   ;;  %v1267_v63 = vld [vmem:[#allocation6 + $0x198] sm:$0xff]   ;;  %v1268_v0 = vld [vmem:[#allocation6 + $0x160] sm:$0xff]  }
  0x47   :  { %1116 = vmatprep.subr.bf16.mxu1 %v1236_v17  ;;  %v115_v47 = vpack.c.bf16 %v87_v43, %v87_v43  ;;  %v88_v48 = vcombine.high %v86_v44, %v86_v44  ;;  %v116_v50 = vpack.c.bf16 %v86_v44, %v86_v44  ;;  %v1269_v1 = vld [vmem:[#allocation6 + $0x1e0] sm:$0xff]   ;;  %v1272_v4 = vld [vmem:[#allocation6 + $0x168] sm:$0xff]   ;;  %v1276_v8 = vld [vmem:[#allocation6 + $0x170] sm:$0xff]  }
  0x48   :  { %v1270_v2 = vld [vmem:[#allocation6 + $0x120] sm:$0xff]   ;;  %v1273_v5 = vld [vmem:[#allocation6 + $0x1e8] sm:$0xff]   ;;  %v1277_v9 = vld [vmem:[#allocation6 + $0x1f0] sm:$0xff]  }
  0x49   :  { %1095 = vmatpush3.bf16.msra.mxu0 %v1237_v18  ;;  %673 = vmatprep.mubr.bf16.mxu0 %v115_v47  ;;  %v117_v52 = vpack.c.bf16 %v88_v48, %v88_v48  ;;  %v1271_v3 = vld [vmem:[#allocation6 + $0x1a0] sm:$0xff]   ;;  %v1274_v6 = vld [vmem:[#allocation6 + $0x128] sm:$0xff]   ;;  %v1278_v10 = vld [vmem:[#allocation6 + $0x130] sm:$0xff]  }
  0x4a   :  { %1117 = vmatpush3.bf16.msra.mxu1 %v1238_v19  ;;  %1096 = vmatprep.subr.bf16.mxu0 %v1239_v20  ;;  %v1275_v7 = vld [vmem:[#allocation6 + $0x1a8] sm:$0xff]   ;;  %v1279_v11 = vld [vmem:[#allocation6 + $0x1b0] sm:$0xff]   ;;  %v1280_v12 = vld [vmem:[#allocation6 + $0x178] sm:$0xff]  }
  0x4b   :  { %1118 = vmatprep.subr.bf16.mxu1 %v1240_v21  ;;  %713 = vmatprep.mubr.bf16.mxu1 %v117_v52  ;;  %v1281_v13 = vld [vmem:[#allocation6 + $0x1f8] sm:$0xff]   ;;  %v1287_v29 = vld [vmem:[#allocation8 + $0x10] sm:$0xff]  }
  0x4c   :  { %v1282_v14 = vld [vmem:[#allocation6 + $0x138] sm:$0xff]  }
  0x4d   :  { %1097 = vmatpush3.bf16.msra.mxu0 %v1241_v25  ;;  %v69_v15 = vld [vmem:[#allocation3 + $0x8] sm:$0xff] }
  0x4e   :  { %1119 = vmatpush3.bf16.msra.mxu1 %v1242_v26  ;;  %1098 = vmatprep.subr.bf16.mxu0 %v1243_v27  ;;  %v1283_v16 = vld [vmem:[#allocation6 + $0x1b8] sm:$0xff]   ;;  %v96_v17 = vrot.slane %v69_v15, %v1482_v35  ;;  %v89_v18 = vcombine.high %v69_v15, %v69_v15  ;;  %v1285_v26 = vld [vmem:[#allocation8] sm:$0xff]   ;;  %v1397_v27 = vmov 0.0  }
  0x4f   :  { %1120 = vmatprep.subr.bf16.mxu1 %v1244_v28  ;;  %v1286_v28 = vld [vmem:[#allocation8 + $0x8] sm:$0xff]   ;;  %v1288_v30 = vld [vmem:[#allocation8 + $0x18] sm:$0xff]  }
  0x50   :  { %v104_v19 = vcombine.high %v96_v17, %v96_v17  ;;  %v103_v20 = vrot.slane %v89_v18, %v1482_v35  ;;  %v118_v21 = vpack.c.bf16 %v96_v17, %v96_v17 }
  0x51   :  { %1099 = vmatpush3.bf16.msra.mxu0 %v1245_v31  ;;  %v1289_v31 = vld [vmem:[#allocation8 + $0x20] sm:$0xff]  }
  0x52   :  { %1121 = vmatpush3.bf16.msra.mxu1 %v1246_v32  ;;  %1100 = vmatprep.subr.bf16.mxu0 %v1247_v33  ;;  %v119_v22 = vpack.c.bf16 %v104_v19, %v104_v19  ;;  %v105_v23 = vcombine.high %v103_v20, %v103_v20  ;;  %v120_v24 = vpack.c.bf16 %v103_v20, %v103_v20  ;;  %v1290_v32 = vld [vmem:[#allocation8 + $0x28] sm:$0xff]   ;;  %v1291_v33 = vld [vmem:[#allocation8 + $0x30] sm:$0xff]  }
  0x53   :  { %1122 = vmatprep.subr.bf16.mxu1 %v1248_v34  ;;  %v1292_v34 = vld [vmem:[#allocation8 + $0x38] sm:$0xff]  }
  0x54   :  { %v121_v25 = vpack.c.bf16 %v105_v23, %v105_v23 }
  0x55   :  { %1101 = vmatpush3.bf16.msra.mxu0 %v1249_v36  ;;  %v1012_v36 = vld [vmem:[%s1514_s2] ss:$0 sm:$0xff] }
  0x56   :  { %1123 = vmatpush3.bf16.msra.mxu1 %v1250_v37  ;;  %1130 = vmatprep.subr.bf16.mxu0 %v1252_v41 }
  0x57   :  { %1152 = vmatprep.subr.bf16.mxu1 %v1253_v42 }
  0x58   :  { %674 = vmatmul.mubr.bf16.vlgmr.msra.gmra.mrb[0].mxu0 %v114_v45 }
  0x59   :  { %1131 = vmatpush3.bf16.msra.mxu0 %v1254_v46  ;;  %714 = vmatmul.mubr.bf16.vlgmr.msra.gmra.mrb[0].mxu1 %v116_v50 }
  0x5a   :  { %1132 = vmatprep.subr.bf16.mxu0 %v1256_v51  ;;  %1153 = vmatpush3.bf16.msra.mxu1 %v1255_v49 }
  0x5b   :  { %1154 = vmatprep.subr.bf16.mxu1 %v1257_v53  ;;  %753 = vmatprep.mubr.bf16.mxu0 %v119_v22 }
  0x5c   :  { %793 = vmatprep.mubr.bf16.mxu1 %v121_v25 }
  0x5d   :  { %1133 = vmatpush3.bf16.msra.mxu0 %v1258_v54 }
  0x5e   :  { %1134 = vmatprep.subr.bf16.mxu0 %v1260_v56  ;;  %1155 = vmatpush3.bf16.msra.mxu1 %v1259_v55 }
  0x5f   :  { %1156 = vmatprep.subr.bf16.mxu1 %v1261_v57 }
  0x61   :  { %1135 = vmatpush3.bf16.msra.mxu0 %v1262_v58 }
  0x62   :  { %1136 = vmatprep.subr.bf16.mxu0 %v1264_v60  ;;  %1157 = vmatpush3.bf16.msra.mxu1 %v1263_v59 }
  0x63   :  { %1158 = vmatprep.subr.bf16.mxu1 %v1265_v61 }
  0x65   :  { %1137 = vmatpush3.bf16.msra.mxu0 %v1266_v62  ;;  %v1077_v62 = vld [vmem:[%s1516_s4] ss:$0 sm:$0xff]  ;;  %s1399_s4 = smov [#allocation9]  }
  0x66   :  { %1138 = vmatprep.subr.bf16.mxu0 %v1268_v0  ;;  %1159 = vmatpush3.bf16.msra.mxu1 %v1267_v63  ;;  %s1002_s20 = sshll.u32 %s1399_s4, 4  ;;  %s1003_s20 = int_to_ptr.vmem [resolvable:$true] %s1002_s20 }
  0x67   :  { %1160 = vmatprep.subr.bf16.mxu1 %v1269_v1  ;;  %s1367_s21 = scalar_lea.vmem %s1003_s20, 32  ;;  %p1368_p11 = scmp.lt.s32.totalorder %s1003_s20, %s1003_s20 }
  0x69   :  { %1139 = vmatpush3.bf16.msra.mxu0 %v1270_v2 }
  0x6a   :  { %1140 = vmatprep.subr.bf16.mxu0 %v1272_v4  ;;  %1161 = vmatpush3.bf16.msra.mxu1 %v1271_v3 }
  0x6b   :  { %1162 = vmatprep.subr.bf16.mxu1 %v1273_v5  ;;  %v915_v5 = vld [vmem:[%s1517_s5] sm:$0x1]  ;;  %s1363_s5 = scalar_lea.vmem %s1003_s20, 16 }
  0x6c   :  { %p1364_p10 = scmp.ne.s32.totalorder %s1003_s20, %s1363_s5  ;;  %p1369_p12 = scmp.lt.s32.totalorder %s1367_s21, %s1363_s5 }
  0x6d   :  { %1141 = vmatpush3.bf16.msra.mxu0 %v1274_v6  ;;  %v917_v6 = vstv %s1518_s6 }
  0x6e   :  { %1142 = vmatprep.subr.bf16.mxu0 %v1276_v8  ;;  %1163 = vmatpush3.bf16.msra.mxu1 %v1275_v7  ;;  %p1370_p13 = por %p1369_p12, %p1368_p11 }
  0x6f   :  { %1164 = vmatprep.subr.bf16.mxu1 %v1277_v9 }
  0x70   :  { %p1371_p0 = pnand %p1370_p13, %p1364_p10 }
  0x71   :  { %1143 = vmatpush3.bf16.msra.mxu0 %v1278_v10 }
  0x72   :  { %1144 = vmatprep.subr.bf16.mxu0 %v1280_v12  ;;  %1165 = vmatpush3.bf16.msra.mxu1 %v1279_v11 }
  0x73   :  { %1166 = vmatprep.subr.bf16.mxu1 %v1281_v13 }
  0x75   :  { %1145 = vmatpush3.bf16.msra.mxu0 %v1282_v14 }
  0x76   :  { %1167 = vmatpush3.bf16.msra.mxu1 %v1283_v16  ;;  %1185 = vmatprep.subr.bf16.mxu0 %v1397_v27 }
  0x77   :  { %1205 = vmatprep.subr.mxu1 %v1397_v27 }
  0x78   :  { %754 = vmatmul.mubr.bf16.vlgmr.msra.gmra.mrb[4].mxu0 %v118_v21 }
  0x79   :  { %794 = vmatmul.mubr.bf16.vlgmr.msra.gmra.mrb[4].mxu1 %v120_v24  ;;  %1186 = vmatpush3.bf16.msra.mxu0 %v1285_v26 }
  0x7a   :  { %1187 = vmatprep.subr.bf16.mxu0 %v1397_v27  ;;  %1201 = vmatprep.mubr.msk.bf16.mxu0 %vm1398_vm0, %v1397_v27 }
  0x7b   :  { %1207 = vmatprep.mubr.msk.f32.mxu1 %vm1398_vm0, %v1397_v27 }
  0x7d   :  { %1188 = vmatpush3.bf16.msra.mxu0 %v1286_v28 }
  0x7e   :  { %1189 = vmatprep.subr.bf16.mxu0 %v1397_v27 }
  0x81   :  { %1190 = vmatpush3.bf16.msra.mxu0 %v1287_v29 }
  0x82   :  { %1191 = vmatprep.subr.bf16.mxu0 %v1397_v27 }
  0x85   :  { %1192 = vmatpush3.bf16.msra.mxu0 %v1288_v30 }
  0x86   :  { %1193 = vmatprep.subr.bf16.mxu0 %v1397_v27 }
  0x89   :  { %1194 = vmatpush3.bf16.msra.mxu0 %v1289_v31 }
  0x8a   :  { %1195 = vmatprep.subr.bf16.mxu0 %v1397_v27 }
  0x8d   :  { %1196 = vmatpush3.bf16.msra.mxu0 %v1290_v32 }
  0x8e   :  { %1197 = vmatprep.subr.bf16.mxu0 %v1397_v27 }
  0x91   :  { %1198 = vmatpush3.bf16.msra.mxu0 %v1291_v33 }
  0x92   :  { %1199 = vmatprep.subr.bf16.mxu0 %v1397_v27 }
  0x95   :  { %1200 = vmatpush3.bf16.msra.mxu0 %v1292_v34 }
 0x12b   :  { %v1102_v35 = vpop.f32.mrb[0].mxu0 }
 0x12c   :  { %v1103_v37 = vpop.f32.mrb[1].mxu0  ;;  %v1124_v38 = vpop.f32.mrb[0].mxu1 }
 0x12d   :  { %v1104_v39 = vadd.f32 %v1103_v37, %v1102_v35  ;;  %v1105_v40 = vpop.f32.mrb[2].mxu0  ;;  %v1125_v41 = vpop.f32.mrb[1].mxu1 }
 0x12e   :  { %v1106_v42 = vpop.f32.mrb[3].mxu0  ;;  %v1126_v44 = vadd.f32 %v1125_v41, %v1124_v38  ;;  %v1127_v45 = vpop.f32.mrb[2].mxu1 }
 0x12f   :  { %v676_v43 = vadd.f32 %v1104_v39, %v1012_v36  ;;  %v1128_v46 = vpop.f32.mrb[3].mxu1 }
 0x131   :  { %v716_v47 = vadd.f32 %v1126_v44, %v676_v43 }
 0x14b   :  { %v1146_v48 = vpop.f32.mrb[4].mxu0 }
 0x14c   :  { %v1147_v49 = vpop.f32.mrb[5].mxu0  ;;  %v1168_v50 = vpop.f32.mrb[4].mxu1 }
 0x14d   :  { %v1148_v51 = vadd.f32 %v1147_v49, %v1146_v48  ;;  %v1149_v52 = vpop.f32.mrb[6].mxu0  ;;  %v1169_v53 = vpop.f32.mrb[5].mxu1 }
 0x14e   :  { %v1150_v54 = vpop.f32.mrb[7].mxu0  ;;  %v1170_v56 = vadd.f32 %v1169_v53, %v1168_v50  ;;  %v1171_v57 = vpop.f32.mrb[6].mxu1 }
 0x14f   :  { %v756_v55 = vadd.f32 %v1148_v51, %v716_v47  ;;  %v1172_v58 = vpop.f32.mrb[7].mxu1 }
 0x151   :  { %v796_v59 = vadd.f32 %v1170_v56, %v756_v55 }
 0x153   :  { %v801_v60 = vmax.f32 %v796_v59, 0.0 }
 0x155   :  { %v802_v61 = vpack.c.bf16 %v801_v60, %v801_v60 }
 0x157   :  { %1202 = vmatmul.mubr.bf16.vlgmr.msra.gmra.mrb[8].mxu0 %v802_v61 }
 0x22a   :  { %v908_v63 = vpop.f32.mrb[8].mxu0 }
 0x22b   :  { %v909_v0 = vadd.f32 %v1077_v62, %v908_v63  ;;  %v1203_v1 = vpop.f32.mrb[9].mxu0 }
 0x22c   :  { %v911_v2 = vpop.f32.mrb[10].mxu0 }
 0x22d   :  { %v914_v3 = vmax.f32 %v909_v0, 0.0  ;;  %v1204_v4 = vpop.f32.mrb[11].mxu0 }
 0x22f   :  { %1206 = vmatpush3.xpose.msra.mxu1 %v914_v3 }
 0x232   :  { %1208 = vmatmul.mubr.f32.vlgmr.msra.gmra.mrb[8].mxu1 %v915_v5 }
 0x305   :  { %v984_v7 = vpop.f32.mrb[8].mxu1 }
 0x306   :  { %v985_v8 = vadd.f32 %v984_v7, %v917_v6  ;;  %v1209_v9 = vpop.f32.mrb[9].mxu1 }
 0x308   :  { %v988_v10 = vsub.f32 0.0, %v985_v8 }
 0x30a   :  { %v989_v11 = vmul.f32 1.442695, %v988_v10 }
 0x30c   :  { %1293 = vpow2.f32 %v989_v11 }
 0x316   :  { %v1294_v12 = vpop.eup %1293 }
 0x317   :  { %v991_v13 = vadd.f32 1.0, %v1294_v12 }
 0x319   :  { %1295 = vrcp.f32 %v991_v13 }
 0x323   :  { %v1296_v14 = vpop.eup %1295 }
 0x324   :  { %995 = vst.msk [vmem:[#allocation9] sm:$0x1] %vm994_vm1, %v1296_v14 }
 0x325   :  { %1374 = shalt.err (!%p1371_p0)
}
 0x326   :  { %s1375_s23 = scalar_lea.hbm %s1519_s7, 16 }
 0x327   :  { %p1376_p1 = scmp.ne.s32.totalorder %s1519_s7, %s1375_s23  ;;  %p1379_p2 = scmp.lt.u32.totalorder %s1375_s23, %s1519_s7 }
 0x329   :  { %p1381_p3 = pnand %p1379_p2, %p1376_p1 }
 0x32b   :  { %1384 = shalt.err (!%p1381_p3)
}
 0x32c   :  { %1005 = dma.vmem_to_hbm [thread:$0]  %s1003_s20, 16, %s1519_s7, [#allocation5]  }
 0x32d   :  { %1389 = dma.done.wait [#allocation5], 16  }
 0x32e   :  { %1390 = vsyncadd [#allocation5], 4294967280 }
 0x32f   :  { %1009 = vsyncpa [#allocation4], 1 }
 0x330   :  { %1010 = vsyncpa [#allocation7], 1 }
 0x331   :  { %1011 = vsyncpa [#allocation5], 1 }

</bundles_post_ra>
